<compile_context>
chip_gen: v5e
topology: v5e:2x2
jax: 0.10.0
libtpu: 0.0.40
codegen_flags: <defaults>
</compile_context>

<pallas_src>
import math

import jax
import jax.numpy as jnp
from jax.experimental import pallas as pl
from jax.experimental.pallas import tpu as pltpu

_LANE = 128
_ONEHOT_NODE_LIMIT = 2048        # beyond this K, the one-hot contraction turns
                                 # the mem-bound kernel MXU-bound (earlier on v5e)
_DEFAULT_VMEM_BUDGET = 40 << 20  # fits v7x's 64 MiB physical VMEM with headroom


def _ceil_to(x, m):
    return ((x + m - 1) // m) * m


# ---------------------------------------------------------------------------
# Kernels
# ---------------------------------------------------------------------------

def _distmult_fused_kernel(src_ref, dst_ref, rid_ref, zT_ref, relT_ref, out_ref):
    """Fully fused edge tile: gathers z_src / z_dst / rel in-kernel.

    src_ref, dst_ref, rid_ref : (1, TE) int32 lane-dense ids
    zT_ref                    : (C, N_pad) node table, resident in VMEM
    relT_ref                  : (C, R_pad) relation table, resident in VMEM
    out_ref                   : (1, TE) f32 scores (lane-dense, unmasked store)
    """
    tile = out_ref.shape[1]

    def onehot_gather(tab_ref, ids):
        # One-hot MXU gather: (C, K) @ onehot(K, TE) -> (C, TE), f32 accumulate.
        k = tab_ref.shape[1]
        onehot = (jax.lax.broadcasted_iota(jnp.int32, (k, tile), 0)
                  == ids).astype(tab_ref.dtype)
        return jnp.dot(tab_ref[...], onehot, preferred_element_type=jnp.float32)

    zs = onehot_gather(zT_ref, src_ref[...])        # (C, TE) f32
    zd = onehot_gather(zT_ref, dst_ref[...])        # (C, TE) f32
    rel = onehot_gather(relT_ref, rid_ref[...])     # (C, TE) f32

    # Triple product in f32, reduce over channels (sublanes), lane-dense store.
    out_ref[...] = jnp.sum(zs * rel * zd, axis=0, keepdims=True)


def _distmult_slab_kernel(zs_ref, zd_ref, relT_ref, rid_ref, out_ref):
    """Fallback tile for large node tables: node gathers done wrapper-side.

    zs_ref, zd_ref : (C, TE) pre-gathered node embeddings (edges on lanes)
    relT_ref       : (C, R_pad) relation table, resident in VMEM
    rid_ref        : (1, TE) int32 relation ids
    out_ref        : (1, TE) f32 scores
    """
    tile = out_ref.shape[1]
    r_pad = relT_ref.shape[1]
    onehot = (jax.lax.broadcasted_iota(jnp.int32, (r_pad, tile), 0)
              == rid_ref[...]).astype(relT_ref.dtype)
    rel = jnp.dot(relT_ref[...], onehot, preferred_element_type=jnp.float32)
    prod = zs_ref[...].astype(jnp.float32) * rel * zd_ref[...].astype(jnp.float32)
    out_ref[...] = jnp.sum(prod, axis=0, keepdims=True)


# ---------------------------------------------------------------------------
# Wrapper
# ---------------------------------------------------------------------------

def distmult_decode(z, edge_index, edge_type, rel_emb, *,
                    edge_tile=8192,
                    compute_dtype=jnp.bfloat16,
                    vmem_budget_bytes=_DEFAULT_VMEM_BUDGET,
                    force_mode=None):
    """DistMult edge scoring.  Returns shape (E,) float32.

    compute_dtype: jnp.bfloat16 (default; halves HBM bytes on all generations,
    bf16 MXU single-pass even on v5e; accumulation stays f32, expect ~1e-2
    relative deviation from an f32 reference) or jnp.float32 for tight results.
    force_mode: None (auto), "fused" (in-kernel gathers), "wrapper" (fallback).
    """
    N, C = z.shape
    R = rel_emb.shape[0]
    E = int(edge_type.shape[0])

    if E == 0:  # guard: empty edge set (avoids tile=0 / division by zero)
        return jnp.zeros((0,), jnp.float32)

    dsize = jnp.dtype(compute_dtype).itemsize
    n_pad = _ceil_to(N, _LANE)
    r_pad = _ceil_to(R, _LANE)

    # Resident relation table, transposed: channels on sublanes, relations on lanes.
    relT = jnp.pad(rel_emb.T.astype(compute_dtype), ((0, 0), (0, r_pad - R)))

    # --- choose gather mode ---------------------------------------------------
    resident_z_bytes = 2 * C * n_pad * dsize      # count 2x (pipeline buffers)
    resident_rel_bytes = 2 * C * r_pad * dsize
    fuse = (n_pad <= _ONEHOT_NODE_LIMIT and
            resident_z_bytes + resident_rel_bytes < vmem_budget_bytes // 2)
    if force_mode == "fused":
        fuse = True
    elif force_mode == "wrapper":
        fuse = False

    # --- edge tile: lane-dense, large, VMEM-budgeted, >= 2 grid steps ---------
    e_ceil = _ceil_to(E, _LANE)
    tile = min(max(_LANE, (int(edge_tile) // _LANE) * _LANE), e_ceil)

    if fuse:
        resident = resident_z_bytes + resident_rel_bytes
        per_edge = (n_pad * dsize                # largest transient: onehot (N_pad, TE)
                    + 3 * C * 4                  # zs / zd / rel gathered, f32
                    + 2 * (3 * 4 + 4))           # double-buffered ids (3x i32) + out f32
    else:
        resident = resident_rel_bytes
        per_edge = (2 * 2 * C * dsize            # double-buffered zs / zd slabs
                    + max(r_pad * dsize, C * 4)  # rel onehot / gathered rel
                    + 2 * (4 + 4))               # double-buffered rid + out
    avail = max(vmem_budget_bytes - resident, _LANE * per_edge)
    tile = min(tile, max(_LANE, (avail // per_edge) // _LANE * _LANE))

    # v7x megacore: keep >= 2 grid steps so "parallel" can split edge tiles
    # across the 2 TensorCores (no-op on v5e/v6e, which have a single TC).
    if tile >= e_ceil and e_ceil >= 2 * _LANE:
        tile = _ceil_to(e_ceil // 2, _LANE)

    e_pad = _ceil_to(E, tile)
    grid = (e_pad // tile,)

    # Padded ids (padded entries = 0, a valid id; padded scores sliced off).
    src = jnp.pad(edge_index[0].astype(jnp.int32), (0, e_pad - E)).reshape(1, e_pad)
    dst = jnp.pad(edge_index[1].astype(jnp.int32), (0, e_pad - E)).reshape(1, e_pad)
    rid = jnp.pad(edge_type.astype(jnp.int32), (0, e_pad - E)).reshape(1, e_pad)

    cparams = pltpu.CompilerParams(
        dimension_semantics=("parallel",),        # edge tiles are independent
        vmem_limit_bytes=int(vmem_budget_bytes),  # explicit budget (v7x: 64 MiB phys)
    )

    if fuse:
        # Resident node table, transposed and lane-padded.
        zT = jnp.pad(z.T.astype(compute_dtype), ((0, 0), (0, n_pad - N)))
        cost = pl.CostEstimate(
            flops=2 * C * (2 * n_pad + r_pad) * e_pad + 3 * C * e_pad,
            transcendentals=0,
            bytes_accessed=(3 * 4 + 4) * e_pad + C * (n_pad + r_pad) * dsize,
        )
        # NOTE: ids/out are ~16 B/edge, so the default double-buffering already
        # hides their DMA; pipeline_mode=pl.Buffered(3) only pays off for big
        # streamed slabs (the fallback path), not here.
        out = pl.pallas_call(
            _distmult_fused_kernel,
            out_shape=jax.ShapeDtypeStruct((1, e_pad), jnp.float32),
            grid_spec=pltpu.PrefetchScalarGridSpec(
                num_scalar_prefetch=0,
                grid=grid,
                in_specs=[
                    pl.BlockSpec((1, tile), lambda i: (0, i)),    # src ids
                    pl.BlockSpec((1, tile), lambda i: (0, i)),    # dst ids
                    pl.BlockSpec((1, tile), lambda i: (0, i)),    # rel ids
                    pl.BlockSpec((C, n_pad), lambda i: (0, 0)),   # z table, resident
                    pl.BlockSpec((C, r_pad), lambda i: (0, 0)),   # rel table, resident
                ],
                out_specs=pl.BlockSpec((1, tile), lambda i: (0, i)),
            ),
            compiler_params=cparams,
            cost_estimate=cost,
        )(src, dst, rid, zT, relT)
    else:
        # Fallback for large node tables: wrapper-side gathers, still emitted in
        # the transposed lane-dense (C, E_pad) layout.
        z_t = z.T.astype(compute_dtype)                    # (C, N)
        zs = jnp.take(z_t, src[0], axis=1)                 # (C, E_pad)
        zd = jnp.take(z_t, dst[0], axis=1)                 # (C, E_pad)
        cost = pl.CostEstimate(
            flops=2 * C * r_pad * e_pad + 3 * C * e_pad,
            transcendentals=0,
            bytes_accessed=(2 * C * dsize + 4 + 4) * e_pad + C * r_pad * dsize,
        )
        out = pl.pallas_call(
            _distmult_slab_kernel,
            out_shape=jax.ShapeDtypeStruct((1, e_pad), jnp.float32),
            grid_spec=pltpu.PrefetchScalarGridSpec(
                num_scalar_prefetch=0,
                grid=grid,
                in_specs=[
                    pl.BlockSpec((C, tile), lambda i: (0, i)),    # z_src slab
                    pl.BlockSpec((C, tile), lambda i: (0, i)),    # z_dst slab
                    pl.BlockSpec((C, r_pad), lambda i: (0, 0)),   # rel table, resident
                    pl.BlockSpec((1, tile), lambda i: (0, i)),    # relation ids
                ],
                out_specs=pl.BlockSpec((1, tile), lambda i: (0, i)),
            ),
            compiler_params=cparams,
            cost_estimate=cost,
        )(zs, zd, relT, rid)

    return out[0, :E]


def xavier_uniform(key, shape, dtype=jnp.float32):
    fan_out, fan_in = shape  # (num_relations, input_channels)
    bound = math.sqrt(6.0 / (fan_in + fan_out))
    return jax.random.uniform(key, shape, dtype=dtype, minval=-bound, maxval=bound)


if __name__ == "__main__":
    key = jax.random.PRNGKey(0)
    k_z, k_rel, k_src, k_dst, k_type = jax.random.split(key, 5)

    num_nodes = 32
    input_channels = 32
    num_relations = 5
    num_edges = 16

    z = jax.random.normal(k_z, (num_nodes, input_channels), dtype=jnp.float32)
    rel_emb = xavier_uniform(k_rel, (num_relations, input_channels))
    src = jax.random.randint(k_src, (num_edges,), 0, num_nodes, dtype=jnp.int32)
    dst = jax.random.randint(k_dst, (num_edges,), 0, num_nodes, dtype=jnp.int32)
    edge_index = jnp.stack([src, dst], axis=0)          # (2, E)
    edge_type = jax.random.randint(k_type, (num_edges,), 0, num_relations,
                                   dtype=jnp.int32)     # (E,)

    # Pure-JAX reference.
    ref = jnp.sum(z[edge_index[0]] * rel_emb[edge_type] * z[edge_index[1]], axis=1)

    # 1) Default path: fused in-kernel gathers, bf16 operands, f32 accumulation.
    out_bf16 = jax.block_until_ready(
        distmult_decode(z, edge_index, edge_type, rel_emb))
    assert out_bf16.shape == (num_edges,)
    assert jnp.allclose(out_bf16, ref, atol=2e-2, rtol=2e-2), "bf16 fused mismatch"

    # 2) f32 operands, fused path.
    out_f32 = jax.block_until_ready(
        distmult_decode(z, edge_index, edge_type, rel_emb,
                        compute_dtype=jnp.float32))
    assert jnp.allclose(out_f32, ref, atol=1e-4, rtol=1e-4), "f32 fused mismatch"

    # 3) Large-N fallback path (wrapper-side gathers), f32.
    out_fb = jax.block_until_ready(
        distmult_decode(z, edge_index, edge_type, rel_emb,
                        compute_dtype=jnp.float32, force_mode="wrapper"))
    assert jnp.allclose(out_fb, ref, atol=1e-5, rtol=1e-5), "fallback mismatch"

    # 4) Empty edge set guard.
    empty = distmult_decode(z, jnp.zeros((2, 0), jnp.int32),
                            jnp.zeros((0,), jnp.int32), rel_emb)
    assert empty.shape == (0,)

    print("KERNEL_OK")
</pallas_src>

<mosaic_0001>
module attributes {stable_mosaic.version = 11 : i64} {
  func.func @_distmult_fused_kernel(%arg0: i32, %arg1: memref<1x128xi32, #tpu.memory_space<vmem>>, %arg2: memref<1x128xi32, #tpu.memory_space<vmem>>, %arg3: memref<1x128xi32, #tpu.memory_space<vmem>>, %arg4: memref<32x128xbf16, #tpu.memory_space<vmem>>, %arg5: memref<32x128xbf16, #tpu.memory_space<vmem>>, %arg6: memref<1x128xf32, #tpu.memory_space<vmem>>) attributes {dimension_semantics = [#tpu.dimension_semantics<parallel>], iteration_bounds = array<i64: 1>, scalar_prefetch = 0 : i64, scratch_operands = 0 : i64, tpu.core_type = #tpu.core_type<tc>, window_params = [{transform_indices = @transform_0, window_bounds = array<i64: 1, 128>}, {transform_indices = @transform_1, window_bounds = array<i64: 1, 128>}, {transform_indices = @transform_2, window_bounds = array<i64: 1, 128>}, {pipeline_mode = #tpu.pipeline_mode<synchronous>, transform_indices = @transform_3, window_bounds = array<i64: 32, 128>}, {pipeline_mode = #tpu.pipeline_mode<synchronous>, transform_indices = @transform_4, window_bounds = array<i64: 32, 128>}, {transform_indices = @transform_5, window_bounds = array<i64: 1, 128>}]} {
    %c0 = arith.constant 0 : index
    %c0_0 = arith.constant 0 : index
    %0 = vector.load %arg1[%c0, %c0_0] : memref<1x128xi32, #tpu.memory_space<vmem>>, vector<1x128xi32>
    %1 = tpu.iota {dimensions = array<i32: 0>} : vector<128x128xi32>
    %2 = vector.broadcast %0 : vector<1x128xi32> to vector<128x128xi32>
    %3 = arith.cmpi eq, %1, %2 : vector<128x128xi32>
    %4 = arith.extui %3 : vector<128x128xi1> to vector<128x128xi32>
    %5 = arith.sitofp %4 : vector<128x128xi32> to vector<128x128xf32>
    %6 = arith.truncf %5 : vector<128x128xf32> to vector<128x128xbf16>
    %c0_1 = arith.constant 0 : index
    %c0_2 = arith.constant 0 : index
    %7 = vector.load %arg4[%c0_1, %c0_2] : memref<32x128xbf16, #tpu.memory_space<vmem>>, vector<32x128xbf16>
    %cst = arith.constant dense<0.000000e+00> : vector<32x128xf32>
    %8 = tpu.matmul %7, %6, %cst {dimension_numbers = #tpu.dot_dimension_numbers<[1], [0], [0], [1], [0, 0, 1, 1], [], []>} : vector<32x128xbf16>, vector<128x128xbf16>, vector<32x128xf32> -> vector<32x128xf32>
    %c0_3 = arith.constant 0 : index
    %c0_4 = arith.constant 0 : index
    %9 = vector.load %arg2[%c0_3, %c0_4] : memref<1x128xi32, #tpu.memory_space<vmem>>, vector<1x128xi32>
    %10 = tpu.iota {dimensions = array<i32: 0>} : vector<128x128xi32>
    %11 = vector.broadcast %9 : vector<1x128xi32> to vector<128x128xi32>
    %12 = arith.cmpi eq, %10, %11 : vector<128x128xi32>
    %13 = arith.extui %12 : vector<128x128xi1> to vector<128x128xi32>
    %14 = arith.sitofp %13 : vector<128x128xi32> to vector<128x128xf32>
    %15 = arith.truncf %14 : vector<128x128xf32> to vector<128x128xbf16>
    %c0_5 = arith.constant 0 : index
    %c0_6 = arith.constant 0 : index
    %16 = vector.load %arg4[%c0_5, %c0_6] : memref<32x128xbf16, #tpu.memory_space<vmem>>, vector<32x128xbf16>
    %cst_7 = arith.constant dense<0.000000e+00> : vector<32x128xf32>
    %17 = tpu.matmul %16, %15, %cst_7 {dimension_numbers = #tpu.dot_dimension_numbers<[1], [0], [0], [1], [0, 0, 1, 1], [], []>} : vector<32x128xbf16>, vector<128x128xbf16>, vector<32x128xf32> -> vector<32x128xf32>
    %c0_8 = arith.constant 0 : index
    %c0_9 = arith.constant 0 : index
    %18 = vector.load %arg3[%c0_8, %c0_9] : memref<1x128xi32, #tpu.memory_space<vmem>>, vector<1x128xi32>
    %19 = tpu.iota {dimensions = array<i32: 0>} : vector<128x128xi32>
    %20 = vector.broadcast %18 : vector<1x128xi32> to vector<128x128xi32>
    %21 = arith.cmpi eq, %19, %20 : vector<128x128xi32>
    %22 = arith.extui %21 : vector<128x128xi1> to vector<128x128xi32>
    %23 = arith.sitofp %22 : vector<128x128xi32> to vector<128x128xf32>
    %24 = arith.truncf %23 : vector<128x128xf32> to vector<128x128xbf16>
    %c0_10 = arith.constant 0 : index
    %c0_11 = arith.constant 0 : index
    %25 = vector.load %arg5[%c0_10, %c0_11] : memref<32x128xbf16, #tpu.memory_space<vmem>>, vector<32x128xbf16>
    %cst_12 = arith.constant dense<0.000000e+00> : vector<32x128xf32>
    %26 = tpu.matmul %25, %24, %cst_12 {dimension_numbers = #tpu.dot_dimension_numbers<[1], [0], [0], [1], [0, 0, 1, 1], [], []>} : vector<32x128xbf16>, vector<128x128xbf16>, vector<32x128xf32> -> vector<32x128xf32>
    %27 = arith.mulf %8, %26 : vector<32x128xf32>
    %28 = arith.mulf %27, %17 : vector<32x128xf32>
    %cst_13 = arith.constant dense<0.000000e+00> : vector<128xf32>
    %29 = vector.multi_reduction <add>, %28, %cst_13 [0] : vector<32x128xf32> to vector<128xf32>
    %30 = vector.shape_cast %29 : vector<128xf32> to vector<1x128xf32>
    %c0_14 = arith.constant 0 : index
    %c0_15 = arith.constant 0 : index
    %31 = vector.load %arg6[%c0_14, %c0_15] : memref<1x128xf32, #tpu.memory_space<vmem>>, vector<1x128xf32>
    tpu.vector_store %arg6[%c0_14, %c0_15], %30 {strides = array<i32>} : memref<1x128xf32, #tpu.memory_space<vmem>>, vector<1x128xf32>,
    return
  }
  func.func @transform_0(%arg0: i32) -> (i32, i32) {
    %c0_i32 = arith.constant 0 : i32
    %c0_i32_0 = arith.constant 0 : i32
    return %c0_i32, %arg0 : i32, i32
  }
  func.func @transform_1(%arg0: i32) -> (i32, i32) {
    %c0_i32 = arith.constant 0 : i32
    %c0_i32_0 = arith.constant 0 : i32
    return %c0_i32, %arg0 : i32, i32
  }
  func.func @transform_2(%arg0: i32) -> (i32, i32) {
    %c0_i32 = arith.constant 0 : i32
    %c0_i32_0 = arith.constant 0 : i32
    return %c0_i32, %arg0 : i32, i32
  }
  func.func @transform_3(%arg0: i32) -> (i32, i32) {
    %c0_i32 = arith.constant 0 : i32
    %c0_i32_0 = arith.constant 0 : i32
    %c0_i32_1 = arith.constant 0 : i32
    return %c0_i32, %c0_i32_0 : i32, i32
  }
  func.func @transform_4(%arg0: i32) -> (i32, i32) {
    %c0_i32 = arith.constant 0 : i32
    %c0_i32_0 = arith.constant 0 : i32
    %c0_i32_1 = arith.constant 0 : i32
    return %c0_i32, %c0_i32_0 : i32, i32
  }
  func.func @transform_5(%arg0: i32) -> (i32, i32) {
    %c0_i32 = arith.constant 0 : i32
    %c0_i32_0 = arith.constant 0 : i32
    return %c0_i32, %arg0 : i32, i32
  }
}

</mosaic_0001>

<bundles_post_ra>
// kernel: tpu_custom_call.1
= control target key start
LH: loop header
LB: loop body
LE: loop exit
PB: predicated region body
PF: predicated region fallthrough
CT: control target
= control target key end

     0   :  { %10 = vsyncpa [#allocation3], 0  ;;  %s822_s0 = inlined_call_operand.hbm [shape: s32[1,128], index: 0, kind: input, shape index: {}]   ;;  %s823_s1 = inlined_call_operand.hbm [shape: s32[1,128], index: 1, kind: input, shape index: {}]   ;;  %s824_s2 = inlined_call_operand.vmem [shape: s32[1,128], index: 2, kind: input, shape index: {}]   ;;  %s825_s3 = inlined_call_operand.hbm [shape: bf16[32,128], index: 3, kind: input, shape index: {}]   ;;  %s826_s4 = inlined_call_operand.hbm [shape: bf16[32,128], index: 4, kind: input, shape index: {}]   ;;  %s827_s5 = inlined_call_operand.hbm [shape: f32[1,128], index: 5, kind: output, shape index: {}]  }
   0x1   :  { %11 = vsyncpa [#allocation6], 0 }
   0x2   :  { %12 = vsyncpa [#allocation9], 0  ;;  %s30_s20 = sshll.u32 %s823_s1, 4  ;;  %s31_s20 = int_to_ptr.hbm [resolvable:$true] %s30_s20 }
   0x3   :  { %13 = vsyncpa [#allocation4], 0  ;;  %s660_s21 = smov [#allocation5]   ;;  %s19_s25 = sshll.u32 %s822_s0, 4  ;;  %s20_s25 = int_to_ptr.hbm [resolvable:$true] %s19_s25 }
   0x4   :  { %s32_s22 = sshll.u32 %s660_s21, 4  ;;  %s661_s26 = smov [#allocation2]   ;;  %s33_s22 = int_to_ptr.vmem [resolvable:$true] %s32_s22 }
   0x5   :  { %35 = dma.hbm_to_vmem [thread:$0]  %s31_s20, 16, %s33_s22, [#allocation6]  }
   0x6   :  { %s21_s27 = sshll.u32 %s661_s26, 4  ;;  %s42_s30 = sshll.u32 %s825_s3, 4  ;;  %s22_s27 = int_to_ptr.vmem [resolvable:$true] %s21_s27  ;;  %s43_s30 = int_to_ptr.hbm [resolvable:$true] %s42_s30 }
   0x7   :  { %24 = dma.hbm_to_vmem [thread:$0]  %s20_s25, 16, %s22_s27, [#allocation3]  }
   0x8   :  { %s662_s1 = smov [#allocation7]   ;;  %s55_s9 = sshll.u32 %s826_s4, 4  ;;  %s56_s9 = int_to_ptr.hbm [resolvable:$true] %s55_s9 }
   0x9   :  { %s44_s6 = sshll.u32 %s662_s1, 4  ;;  %s663_s10 = smov 64   ;;  %s45_s6 = int_to_ptr.vmem [resolvable:$true] %s44_s6 }
   0xa   :  { %s664_s0 = smov 4   ;;  %s665_s11 = smov [#allocation8]  }
   0xb   :  { %50 = dma.hbm_to_vmem [thread:$0]  %s43_s30, 256, %s45_s6, [#allocation6], %s663_s10, %s663_s10, %s664_s0  }
   0xc   :  { %s57_s12 = sshll.u32 %s665_s11, 4  ;;  %s58_s12 = int_to_ptr.vmem [resolvable:$true] %s57_s12 }
   0xd   :  { %63 = dma.hbm_to_vmem [thread:$0]  %s56_s9, 256, %s58_s12, [#allocation9], %s663_s10, %s663_s10, %s664_s0  }
   0xe   :  { %652 = dma.done.wait [#allocation3], 16  }
   0xf   :  { %653 = vsyncadd [#allocation3], 4294967280 }
  0x10   :  { %654 = dma.done.wait [#allocation6], 272  }
  0x11   :  { %655 = vsyncadd [#allocation6], 4294967024 }
  0x12   :  { %656 = dma.done.wait [#allocation9], 256  }
  0x13   :  { %657 = vsyncadd [#allocation9], 4294967040  ;;  %v81_v0 = vlaneseq  ;;  %v718_v8 = vld [vmem:[#allocation5] ss:$0 sm:$0xff]  ;;  %v723_v9 = vld [vmem:[%s824_s2] ss:$0 sm:$0xff] }
  0x14   :  { %v725_v10 = vld [vmem:[#allocation2] ss:$0 sm:$0xff]  ;;  %v666_v11 = vmov 1.0|1.0   ;;  %v509_v21 = vld [vmem:[#allocation7] sm:$0xff]  ;;  %v511_v22 = vld [vmem:[#allocation8] sm:$0xff] }
  0x15   :  { %v710_v1 = vshrl.u32 %v81_v0, 7  ;;  %v510_v23 = vld [vmem:[#allocation7 + $0x8] sm:$0xff]  ;;  %v512_v24 = vld [vmem:[#allocation8 + $0x8] sm:$0xff]  ;;  %s667_s2 = smov [#allocation10]   ;;  %s385_s16 = sshll.u32 %s827_s5, 4  ;;  %s386_s16 = int_to_ptr.hbm [resolvable:$true] %s385_s16 }
  0x16   :  { %s383_s13 = sshll.u32 %s667_s2, 4  ;;  %s384_s13 = int_to_ptr.vmem [resolvable:$true] %s383_s13 }
  0x17   :  { %v96_v2 = vadd.s32 112, %v710_v1  ;;  %v97_v3 = vadd.s32 120, %v710_v1  ;;  %v94_v4 = vadd.s32 96, %v710_v1  ;;  %v95_v5 = vadd.s32 104, %v710_v1 }
  0x18   :  { %v92_v6 = vadd.s32 80, %v710_v1  ;;  %v93_v7 = vadd.s32 88, %v710_v1  ;;  %v90_v12 = vadd.s32 64, %v710_v1  ;;  %v91_v13 = vadd.s32 72, %v710_v1 }
  0x19   :  { %vm206_vm0 = vcmp.eq.s32.totalorder %v96_v2, %v718_v8  ;;  %vm207_vm1 = vcmp.eq.s32.totalorder %v97_v3, %v718_v8  ;;  %vm204_vm2 = vcmp.eq.s32.totalorder %v94_v4, %v718_v8  ;;  %vm205_vm3 = vcmp.eq.s32.totalorder %v95_v5, %v718_v8 }
  0x1a   :  { %vm453_vm4 = vmpackc.low %vm207_vm1, %vm206_vm0  ;;  %vm283_vm5 = vcmp.eq.s32.totalorder %v96_v2, %v723_v9  ;;  %vm284_vm6 = vcmp.eq.s32.totalorder %v97_v3, %v723_v9  ;;  %vm281_vm7 = vcmp.eq.s32.totalorder %v94_v4, %v723_v9  ;;  %vm282_vm8 = vcmp.eq.s32.totalorder %v95_v5, %v723_v9 }
  0x1b   :  { %454 = vmatpush.bf16.msk.msra.mxu1 %vm453_vm4, %v666_v11  ;;  %vm493_vm9 = vmpackc.low %vm284_vm6, %vm283_vm5  ;;  %vm113_vm10 = vcmp.eq.s32.totalorder %v96_v2, %v725_v10  ;;  %vm114_vm11 = vcmp.eq.s32.totalorder %v97_v3, %v725_v10  ;;  %vm202_vm13 = vcmp.eq.s32.totalorder %v92_v6, %v718_v8  ;;  %vm203_vm14 = vcmp.eq.s32.totalorder %v93_v7, %v718_v8 }
  0x1c   :  { %494 = vmatpush.bf16.msk.msra.mxu2 %vm493_vm9, %v666_v11  ;;  %vm455_vm12 = vmpackc.low %vm205_vm3, %vm204_vm2  ;;  %vm279_vm0 = vcmp.eq.s32.totalorder %v92_v6, %v723_v9  ;;  %vm280_vm1 = vcmp.eq.s32.totalorder %v93_v7, %v723_v9  ;;  %vm111_vm5 = vcmp.eq.s32.totalorder %v94_v4, %v725_v10  ;;  %vm112_vm6 = vcmp.eq.s32.totalorder %v95_v5, %v725_v10 }
  0x1d   :  { %vm495_vm15 = vmpackc.low %vm282_vm8, %vm281_vm7  ;;  %vm200_vm7 = vcmp.eq.s32.totalorder %v90_v12, %v718_v8  ;;  %vm201_vm8 = vcmp.eq.s32.totalorder %v91_v13, %v718_v8  ;;  %v88_v14 = vadd.s32 48, %v710_v1  ;;  %v89_v15 = vadd.s32 56, %v710_v1 }
  0x1e   :  { %vm421_vm4 = vmpackc.low %vm114_vm11, %vm113_vm10  ;;  %vm109_vm10 = vcmp.eq.s32.totalorder %v92_v6, %v725_v10  ;;  %vm110_vm11 = vcmp.eq.s32.totalorder %v93_v7, %v725_v10  ;;  %v86_v16 = vadd.s32 32, %v710_v1  ;;  %v87_v17 = vadd.s32 40, %v710_v1 }
  0x1f   :  { %456 = vmatpush.bf16.msk.msra.mxu1 %vm455_vm12, %v666_v11  ;;  %422 = vmatpush.bf16.msk.msra.mxu0 %vm421_vm4, %v666_v11  ;;  %vm457_vm2 = vmpackc.low %vm203_vm14, %vm202_vm13  ;;  %vm277_vm12 = vcmp.eq.s32.totalorder %v90_v12, %v723_v9  ;;  %vm278_vm13 = vcmp.eq.s32.totalorder %v91_v13, %v723_v9  ;;  %v84_v18 = vadd.s32 16, %v710_v1  ;;  %v85_v19 = vadd.s32 24, %v710_v1 }
  0x20   :  { %496 = vmatpush.bf16.msk.msra.mxu2 %vm495_vm15, %v666_v11  ;;  %513 = vmatpush.bf16.msk.msra.mxu3 %vm421_vm4, %v666_v11  ;;  %vm497_vm3 = vmpackc.low %vm280_vm1, %vm279_vm0  ;;  %vm198_vm0 = vcmp.eq.s32.totalorder %v88_v14, %v718_v8  ;;  %vm199_vm1 = vcmp.eq.s32.totalorder %v89_v15, %v718_v8  ;;  %v83_v20 = vadd.s32 8, %v710_v1 }
  0x21   :  { %vm423_vm9 = vmpackc.low %vm112_vm6, %vm111_vm5  ;;  %vm107_vm5 = vcmp.eq.s32.totalorder %v90_v12, %v725_v10  ;;  %vm108_vm6 = vcmp.eq.s32.totalorder %v91_v13, %v725_v10 }
  0x22   :  { %vm459_vm14 = vmpackc.low %vm201_vm8, %vm200_vm7 }
  0x23   :  { %458 = vmatpush.bf16.msk.msra.mxu1 %vm457_vm2, %v666_v11  ;;  %424 = vmatpush.bf16.msk.msra.mxu0 %vm423_vm9, %v666_v11  ;;  %vm425_vm15 = vmpackc.low %vm110_vm11, %vm109_vm10  ;;  %vm275_vm2 = vcmp.eq.s32.totalorder %v88_v14, %v723_v9  ;;  %vm197_vm10 = vcmp.eq.s32.totalorder %v87_v17, %v718_v8 }
  0x24   :  { %498 = vmatpush.bf16.msk.msra.mxu2 %vm497_vm3, %v666_v11  ;;  %514 = vmatpush.bf16.msk.msra.mxu3 %vm423_vm9, %v666_v11  ;;  %vm499_vm4 = vmpackc.low %vm278_vm13, %vm277_vm12  ;;  %vm276_vm3 = vcmp.eq.s32.totalorder %v89_v15, %v723_v9  ;;  %vm196_vm9 = vcmp.eq.s32.totalorder %v86_v16, %v718_v8  ;;  %vm105_vm12 = vcmp.eq.s32.totalorder %v88_v14, %v725_v10 }
  0x25   :  { %vm461_vm7 = vmpackc.low %vm199_vm1, %vm198_vm0  ;;  %vm106_vm13 = vcmp.eq.s32.totalorder %v89_v15, %v725_v10  ;;  %vm274_vm0 = vcmp.eq.s32.totalorder %v87_v17, %v723_v9 }
  0x26   :  { %vm427_vm8 = vmpackc.low %vm108_vm6, %vm107_vm5  ;;  %vm195_vm5 = vcmp.eq.s32.totalorder %v85_v19, %v718_v8 }
  0x27   :  { %460 = vmatpush.bf16.msk.msra.mxu1 %vm459_vm14, %v666_v11  ;;  %426 = vmatpush.bf16.msk.msra.mxu0 %vm425_vm15, %v666_v11  ;;  %vm501_vm11 = vmpackc.low %vm276_vm3, %vm275_vm2  ;;  %vm273_vm14 = vcmp.eq.s32.totalorder %v86_v16, %v723_v9  ;;  %vm103_vm2 = vcmp.eq.s32.totalorder %v86_v16, %v725_v10  ;;  %vm104_vm3 = vcmp.eq.s32.totalorder %v87_v17, %v725_v10 }
  0x28   :  { %500 = vmatpush.bf16.msk.msra.mxu2 %vm499_vm4, %v666_v11  ;;  %515 = vmatpush.bf16.msk.msra.mxu3 %vm425_vm15, %v666_v11  ;;  %vm463_vm15 = vmpackc.low %vm197_vm10, %vm196_vm9  ;;  %vm194_vm4 = vcmp.eq.s32.totalorder %v84_v18, %v718_v8  ;;  %vm272_vm9 = vcmp.eq.s32.totalorder %v85_v19, %v723_v9 }
  0x29   :  { %vm429_vm1 = vmpackc.low %vm106_vm13, %vm105_vm12  ;;  %vm193_vm12 = vcmp.eq.s32.totalorder %v83_v20, %v718_v8 }
  0x2a   :  { %vm503_vm6 = vmpackc.low %vm274_vm0, %vm273_vm14  ;;  %vm101_vm14 = vcmp.eq.s32.totalorder %v84_v18, %v725_v10  ;;  %vm102_vm0 = vcmp.eq.s32.totalorder %v85_v19, %v725_v10 }
  0x2b   :  { %462 = vmatpush.bf16.msk.msra.mxu1 %vm461_vm7, %v666_v11  ;;  %428 = vmatpush.bf16.msk.msra.mxu0 %vm427_vm8, %v666_v11  ;;  %vm271_vm7 = vcmp.eq.s32.totalorder %v84_v18, %v723_v9  ;;  %vm431_vm10 = vmpackc.low %vm104_vm3, %vm103_vm2  ;;  %vm99_vm2 = vcmp.eq.s32.totalorder %v710_v1, %v725_v10  ;;  %vm100_vm3 = vcmp.eq.s32.totalorder %v83_v20, %v725_v10 }
  0x2c   :  { %502 = vmatpush.bf16.msk.msra.mxu2 %vm501_vm11, %v666_v11  ;;  %516 = vmatpush.bf16.msk.msra.mxu3 %vm427_vm8, %v666_v11  ;;  %vm465_vm8 = vmpackc.low %vm195_vm5, %vm194_vm4  ;;  %vm192_vm11 = vcmp.eq.s32.totalorder %v710_v1, %v718_v8  ;;  %vm270_vm4 = vcmp.eq.s32.totalorder %v83_v20, %v723_v9 }
  0x2d   :  { %vm505_vm13 = vmpackc.low %vm272_vm9, %vm271_vm7 }
  0x2e   :  { %vm433_vm5 = vmpackc.low %vm102_vm0, %vm101_vm14 }
  0x2f   :  { %464 = vmatpush.bf16.msk.msra.mxu1 %vm463_vm15, %v666_v11  ;;  %430 = vmatpush.bf16.msk.msra.mxu0 %vm429_vm1, %v666_v11  ;;  %vm269_vm15 = vcmp.eq.s32.totalorder %v710_v1, %v723_v9  ;;  %vm435_vm7 = vmpackc.low %vm100_vm3, %vm99_vm2 }
  0x30   :  { %504 = vmatpush.bf16.msk.msra.mxu2 %vm503_vm6, %v666_v11  ;;  %517 = vmatpush.bf16.msk.msra.mxu3 %vm429_vm1, %v666_v11  ;;  %vm467_vm1 = vmpackc.low %vm193_vm12, %vm192_vm11 }
  0x31   :  { %vm507_vm6 = vmpackc.low %vm270_vm4, %vm269_vm15 }
  0x33   :  { %466 = vmatpush.bf16.msk.msra.mxu1 %vm465_vm8, %v666_v11  ;;  %432 = vmatpush.bf16.msk.msra.mxu0 %vm431_vm10, %v666_v11 }
  0x34   :  { %506 = vmatpush.bf16.msk.msra.mxu2 %vm505_vm13, %v666_v11  ;;  %518 = vmatpush.bf16.msk.msra.mxu3 %vm431_vm10, %v666_v11 }
  0x37   :  { %468 = vmatpush.bf16.msk.msra.mxu1 %vm467_vm1, %v666_v11  ;;  %434 = vmatpush.bf16.msk.msra.mxu0 %vm433_vm5, %v666_v11 }
  0x38   :  { %508 = vmatpush.bf16.msk.msra.mxu2 %vm507_vm6, %v666_v11  ;;  %519 = vmatpush.bf16.msk.msra.mxu3 %vm433_vm5, %v666_v11 }
  0x3a   :  { %256 = vmatmul.bf16.vlgmr.msra.gmra.mxu1 %v509_v21 }
  0x3b   :  { %349 = vmatmul.bf16.vlgmr.msra.gmra.mxu2 %v511_v22  ;;  %436 = vmatpush.bf16.msk.msra.mxu0 %vm435_vm7, %v666_v11 }
  0x3c   :  { %520 = vmatpush.bf16.msk.msra.mxu3 %vm435_vm7, %v666_v11 }
  0x3e   :  { %179 = vmatmul.bf16.vlgmr.msra.gmra.mxu0 %v509_v21 }
  0x3f   :  { %184 = vmatmul.bf16.vlgmr.msra.gmra.mxu3 %v510_v23 }
  0x4a   :  { %261 = vmatmul.bf16.gmra.mxu1 %v510_v23 }
  0x4b   :  { %354 = vmatmul.bf16.gmra.mxu2 %v512_v24 }
  0xb7   :  { %v257_v25 = vpop.f32.mrf.mxu1 }
  0xbb   :  { %v180_v27 = vpop.f32.mrf.mxu0 }
  0xbe   :  { %v350_v26 = vpop.f32.mrf.mxu2 }
  0xbf   :  { %v259_v28 = vpop.f32.mrf.mxu1  ;;  %v360_v35 = vmul.f32 %v350_v26, %v180_v27 }
  0xc1   :  { %v364_v38 = vmul.f32 %v360_v35, %v257_v25 }
  0xc2   :  { %v185_v31 = vpop.f32.mrf.mxu3 }
  0xc3   :  { %v182_v30 = vpop.f32.mrf.mxu0 }
  0xc6   :  { %v352_v29 = vpop.f32.mrf.mxu2 }
  0xc7   :  { %v262_v32 = vpop.f32.mrf.mxu1  ;;  %v361_v34 = vmul.f32 %v352_v29, %v182_v30 }
  0xc9   :  { %v365_v37 = vmul.f32 %v361_v34, %v259_v28 }
  0xca   :  { %v187_v40 = vpop.f32.mrf.mxu3 }
  0xcb   :  { %v368_v42 = vadd.f32 %v365_v37, %v364_v38 }
  0xce   :  { %v355_v33 = vpop.f32.mrf.mxu2 }
  0xcf   :  { %v362_v36 = vmul.f32 %v355_v33, %v185_v31  ;;  %v264_v44 = vpop.f32.mrf.mxu1 }
  0xd1   :  { %v366_v39 = vmul.f32 %v362_v36, %v262_v32 }
  0xd3   :  { %v369_v45 = vadd.f32 %v368_v42, %v366_v39 }
  0xd6   :  { %v357_v41 = vpop.f32.mrf.mxu2 }
  0xd7   :  { %v363_v43 = vmul.f32 %v357_v41, %v187_v40 }
  0xd9   :  { %v367_v46 = vmul.f32 %v363_v43, %v264_v44 }
  0xdb   :  { %v370_v47 = vadd.f32 %v369_v45, %v367_v46 }
  0xdd   :  { %v371_v48 = vrot.slane %v370_v47, 4 }
  0xdf   :  { %v372_v49 = vadd.f32 %v371_v48, %v370_v47 }
  0xe1   :  { %v373_v50 = vrot.slane %v372_v49, 2 }
  0xe3   :  { %v374_v51 = vadd.f32 %v373_v50, %v372_v49 }
  0xe5   :  { %v375_v52 = vrot.slane %v374_v51, 1 }
  0xe7   :  { %v376_v53 = vadd.f32 %v375_v52, %v374_v51 }
  0xe9   :  { %377 = vst [vmem:[#allocation10] sm:$0x1] %v376_v53 }
  0xea   :  { %388 = dma.vmem_to_hbm [thread:$0]  %s384_s13, 16, %s386_s16, [#allocation4]  }
  0xeb   :  { %658 = dma.done.wait [#allocation4], 16  }
  0xec   :  { %659 = vsyncadd [#allocation4], 4294967280 }
  0xed   :  { %393 = vsyncpa [#allocation3], 1 }
  0xee   :  { %394 = vsyncpa [#allocation6], 1 }
  0xef   :  { %395 = vsyncpa [#allocation9], 1 }
  0xf0   :  { %396 = vsyncpa [#allocation4], 1 }

</bundles_post_ra>
